<compile_context>
chip_gen: v7x
topology: tpu7x:2x2x1
jax: 0.10.0
libtpu: 0.0.40
codegen_flags: <defaults>
</compile_context>

<pallas_src>
import jax
import jax.numpy as jnp
import numpy as np
from jax.experimental import pallas as pl
from jax.experimental.pallas import tpu as pltpu

INPUT_DIM = 12    # len(columns) - 1
HIDDEN_DIM = 20
OUTPUT_DIM = 1

# ---- packed parameter slab layout (HIDDEN_DIM rows x SLAB_COLS lanes) ------
W1_COL = 0                               # (HIDDEN_DIM, INPUT_DIM)   W1 (out,in)
W2_COL = W1_COL + INPUT_DIM              # (HIDDEN_DIM, HIDDEN_DIM)  W2 (out,in)
B1_COL = W2_COL + HIDDEN_DIM             # (HIDDEN_DIM, 1)           b1
B2_COL = B1_COL + 1                      # (HIDDEN_DIM, 1)           b2
W3_COL = B2_COL + 1                      # (HIDDEN_DIM, 1)           W3^T column
B3_COL = W3_COL + 1                      # scalar at row 0           b3
SLAB_COLS = B3_COL + 1                   # = 36 (fits one 128-lane tile)


def _round_up(n, m):
    return ((n + m - 1) // m) * m


def _cdiv(a, b):
    return (a + b - 1) // b


def ann_kernel(xt_ref, slab_ref, o_ref):
    # Feature-major: features on sublanes, batch on the 128-wide lane axis.
    xt = xt_ref[...].astype(jnp.float32)                              # (12, TB)

    # Static slices of the single VMEM-resident parameter slab (all within one
    # 128-lane tile, so these are cheap views / relayouts, no HBM traffic).
    w1 = slab_ref[:, W1_COL:W1_COL + INPUT_DIM].astype(jnp.float32)   # (20, 12)
    w2 = slab_ref[:, W2_COL:W2_COL + HIDDEN_DIM].astype(jnp.float32)  # (20, 20)
    b1 = slab_ref[:, B1_COL:B1_COL + 1].astype(jnp.float32)           # (20, 1)
    b2 = slab_ref[:, B2_COL:B2_COL + 1].astype(jnp.float32)           # (20, 1)
    w3c = slab_ref[:, W3_COL:W3_COL + 1].astype(jnp.float32)          # (20, 1)
    b3 = slab_ref[0:1, B3_COL:B3_COL + 1].astype(jnp.float32)         # (1, 1)

    # fc1 + ReLU: (20,12) @ (12,TB) -> (20,TB), lane-dense.
    h1 = jnp.maximum(
        jnp.dot(w1, xt, preferred_element_type=jnp.float32) + b1, 0.0)
    # fc2 + ReLU: (20,20) @ (20,TB) -> (20,TB).
    h2 = jnp.maximum(
        jnp.dot(w2, h1, preferred_element_type=jnp.float32) + b2, 0.0)
    # fc3: contract the 20-wide feature (sublane) axis with a VPU multiply +
    # XLU sublane reduce -> lane-dense (1, TB) row (no degenerate MXU matmul,
    # no masked 1-lane stores).
    out = jnp.sum(w3c * h2, axis=0, keepdims=True) + b3               # (1, TB)

    o_ref[...] = out.astype(o_ref.dtype)


def _ann_jnp(x, slab):
    """Plain fused-XLA path for small batches (pallas_call overhead dominates)."""
    slab = slab.astype(jnp.float32)
    x = x.astype(jnp.float32)
    w1 = slab[:, W1_COL:W1_COL + INPUT_DIM]
    w2 = slab[:, W2_COL:W2_COL + HIDDEN_DIM]
    b1 = slab[:, B1_COL]
    b2 = slab[:, B2_COL]
    w3 = slab[:, W3_COL]
    b3 = slab[0, B3_COL]
    h1 = jnp.maximum(x @ w1.T + b1, 0.0)
    h2 = jnp.maximum(h1 @ w2.T + b2, 0.0)
    return h2 @ w3[:, None] + b3


def ann_forward(x, slab, *, tile_batch=4096, min_pallas_batch=0, x_buffers=2):
    """x: (B, INPUT_DIM) f32 or bf16; slab: packed params. Returns (B, 1) f32.

    For tiny batches (B < min_pallas_batch) the fused-XLA path is used; only
    genuinely large batches go through pallas_call.
    """
    B = x.shape[0]
    if B < min_pallas_batch:
        return _ann_jnp(x, slab)

    # Lane-aligned tile size (multiple of 128), never trusted from the caller.
    TB = max(128, min(_round_up(int(tile_batch), 128), _round_up(max(B, 1), 128)))
    n_tiles = _cdiv(B, TB)
    if n_tiles > 1 and n_tiles % 2:
        # Rebalance for v7x's two TensorCores: slightly smaller tiles, even
        # tile count, so both cores get the same amount of real work.
        TB = max(128, _round_up(_cdiv(B, n_tiles + 1), 128))
        n_tiles = _cdiv(B, TB)
        if n_tiles % 2:
            n_tiles += 1                      # last resort: one padding tile
    B_pad = n_tiles * TB

    # Feature-major input: (INPUT_DIM, B_pad).  One-pass copy over a tiny
    # array; keeps the caller's dtype (bf16 x halves HBM traffic on v6e/v7x,
    # kernel upcasts to f32 before any VPU math -- correct for v5e too).
    xt = jnp.pad(x, ((0, B_pad - B), (0, 0))).T

    x_spec_kwargs = {}
    if x_buffers > 2:
        # Only needed if profiling shows exposed x-DMA per step.
        x_spec_kwargs["pipeline_mode"] = pl.Buffered(int(x_buffers))

    out = pl.pallas_call(
        ann_kernel,
        out_shape=jax.ShapeDtypeStruct((OUTPUT_DIM, B_pad), jnp.float32),
        grid_spec=pltpu.PrefetchScalarGridSpec(
            num_scalar_prefetch=0,
            grid=(n_tiles,),
            in_specs=[
                # Streamed x tile, lane-dense along batch.
                pl.BlockSpec((INPUT_DIM, TB), lambda i: (0, i), **x_spec_kwargs),
                # Single VMEM-resident parameter slab (constant block index).
                pl.BlockSpec((HIDDEN_DIM, SLAB_COLS), lambda i: (0, 0)),
            ],
            # Lane-dense (1, TB) output row per grid step.
            out_specs=pl.BlockSpec((OUTPUT_DIM, TB), lambda i: (0, i)),
        ),
        compiler_params=pltpu.CompilerParams(
            dimension_semantics=("parallel",)),   # megacore split on v7x
    )(xt, slab)

    # (1, B_pad) row -> (B_pad, 1) column -> drop padded rows.
    return out.reshape(B_pad, OUTPUT_DIM)[:B]


def init_params(key):
    """Deterministic init mimicking nn.Linear's U(-1/sqrt(fan_in), ...).
    Weights kept in PyTorch-native (out_features, in_features) layout."""
    ks = jax.random.split(key, 6)

    def linear(kw, kb, fan_in, fan_out):
        bound = 1.0 / np.sqrt(fan_in)
        w = jax.random.uniform(kw, (fan_out, fan_in), jnp.float32, -bound, bound)
        b = jax.random.uniform(kb, (fan_out,), jnp.float32, -bound, bound)
        return w, b

    w1, b1 = linear(ks[0], ks[1], INPUT_DIM, HIDDEN_DIM)
    w2, b2 = linear(ks[2], ks[3], HIDDEN_DIM, HIDDEN_DIM)
    w3, b3 = linear(ks[4], ks[5], HIDDEN_DIM, OUTPUT_DIM)
    return {"w1": w1, "b1": b1, "w2": w2, "b2": b2, "w3": w3, "b3": b3}


def pack_params(p, dtype=jnp.float32):
    """Pack all fc1/fc2/fc3 weights+biases into one (HIDDEN_DIM, 36) slab."""
    slab = jnp.zeros((HIDDEN_DIM, SLAB_COLS), dtype)
    slab = slab.at[:, W1_COL:W1_COL + INPUT_DIM].set(p["w1"].astype(dtype))
    slab = slab.at[:, W2_COL:W2_COL + HIDDEN_DIM].set(p["w2"].astype(dtype))
    slab = slab.at[:, B1_COL].set(p["b1"].astype(dtype))
    slab = slab.at[:, B2_COL].set(p["b2"].astype(dtype))
    slab = slab.at[:, W3_COL].set(p["w3"][0].astype(dtype))
    slab = slab.at[0, B3_COL].set(p["b3"][0].astype(dtype))
    return slab


def ann_reference(x, p):
    x = x.astype(jnp.float32)
    h1 = jnp.maximum(x @ p["w1"].T + p["b1"], 0.0)
    h2 = jnp.maximum(h1 @ p["w2"].T + p["b2"], 0.0)
    return h2 @ p["w3"].T + p["b3"]


if __name__ == "__main__":
    key = jax.random.PRNGKey(0)
    k_param, k_x = jax.random.split(key)
    params = init_params(k_param)
    slab = pack_params(params)

    # Ragged batch (not a multiple of 128) exercises padding, lane-dense
    # feature-major tiles, and the multi-step megacore-parallel grid.
    batch = 1000
    x = jax.random.normal(k_x, (batch, INPUT_DIM), jnp.float32)
    ref = ann_reference(x, params)

    # 1) Default: whole batch fits one big lane-aligned tile.
    out1 = jax.block_until_ready(ann_forward(x, slab))
    np.testing.assert_allclose(np.asarray(out1), np.asarray(ref), rtol=1e-5, atol=1e-5)
    assert out1.shape == (batch, OUTPUT_DIM)

    # 2) Multi-tile grid; tile_batch=384 triggers odd->even rebalance (4 x 256).
    out2 = jax.block_until_ready(ann_forward(x, slab, tile_batch=384))
    np.testing.assert_allclose(np.asarray(out2), np.asarray(ref), rtol=1e-5, atol=1e-5)

    # 3) bf16 x stream (halves HBM traffic on v6e/v7x); compare against a
    #    reference fed the same quantized input so the tolerance stays tight.
    x_bf16 = x.astype(jnp.bfloat16)
    out3 = jax.block_until_ready(ann_forward(x_bf16, slab, tile_batch=256))
    ref_bf16 = ann_reference(x_bf16.astype(jnp.float32), params)
    np.testing.assert_allclose(np.asarray(out3), np.asarray(ref_bf16), rtol=1e-5, atol=1e-5)

    # 4) Small-batch fast path (plain fused XLA) has identical semantics.
    out4 = jax.block_until_ready(ann_forward(x, slab, min_pallas_batch=1 << 16))
    np.testing.assert_allclose(np.asarray(out4), np.asarray(ref), rtol=1e-5, atol=1e-5)

    print("KERNEL_OK")
</pallas_src>

<mosaic_0001>
module attributes {stable_mosaic.version = 11 : i64} {
  func.func @ann_kernel(%arg0: i32, %arg1: memref<12x1024xf32, #tpu.memory_space<vmem>>, %arg2: memref<20x36xf32, #tpu.memory_space<vmem>>, %arg3: memref<1x1024xf32, #tpu.memory_space<vmem>>) attributes {dimension_semantics = [#tpu.dimension_semantics<parallel>], iteration_bounds = array<i64: 1>, scalar_prefetch = 0 : i64, scratch_operands = 0 : i64, tpu.core_type = #tpu.core_type<tc>, window_params = [{transform_indices = @transform_0, window_bounds = array<i64: 12, 1024>}, {pipeline_mode = #tpu.pipeline_mode<synchronous>, transform_indices = @transform_1, window_bounds = array<i64: 20, 36>}, {transform_indices = @transform_2, window_bounds = array<i64: 1, 1024>}]} {
    %c0 = arith.constant 0 : index
    %c0_0 = arith.constant 0 : index
    %0 = vector.load %arg1[%c0, %c0_0] : memref<12x1024xf32, #tpu.memory_space<vmem>>, vector<12x1024xf32>
    %c0_1 = arith.constant 0 : index
    %c0_2 = arith.constant 0 : index
    %1 = vector.load %arg2[%c0_1, %c0_2] : memref<20x36xf32, #tpu.memory_space<vmem>>, vector<20x12xf32>
    %c0_3 = arith.constant 0 : index
    %c12 = arith.constant 12 : index
    %2 = vector.load %arg2[%c0_3, %c12] : memref<20x36xf32, #tpu.memory_space<vmem>>, vector<20x20xf32>
    %c0_4 = arith.constant 0 : index
    %c32 = arith.constant 32 : index
    %3 = vector.load %arg2[%c0_4, %c32] : memref<20x36xf32, #tpu.memory_space<vmem>>, vector<20x1xf32>
    %c0_5 = arith.constant 0 : index
    %c33 = arith.constant 33 : index
    %4 = vector.load %arg2[%c0_5, %c33] : memref<20x36xf32, #tpu.memory_space<vmem>>, vector<20x1xf32>
    %c0_6 = arith.constant 0 : index
    %c34 = arith.constant 34 : index
    %5 = vector.load %arg2[%c0_6, %c34] : memref<20x36xf32, #tpu.memory_space<vmem>>, vector<20x1xf32>
    %c0_7 = arith.constant 0 : index
    %c35 = arith.constant 35 : index
    %6 = vector.load %arg2[%c0_7, %c35] : memref<20x36xf32, #tpu.memory_space<vmem>>, vector<1x1xf32>
    %cst = arith.constant dense<0.000000e+00> : vector<20x1024xf32>
    %7 = tpu.matmul %1, %0, %cst {dimension_numbers = #tpu.dot_dimension_numbers<[1], [0], [0], [1], [0, 0, 1, 1], [], []>} : vector<20x12xf32>, vector<12x1024xf32>, vector<20x1024xf32> -> vector<20x1024xf32>
    %8 = vector.broadcast %3 : vector<20x1xf32> to vector<20x1024xf32>
    %9 = arith.addf %7, %8 : vector<20x1024xf32>
    %cst_8 = arith.constant 0.000000e+00 : f32
    %10 = vector.broadcast %cst_8 : f32 to vector<20x1024xf32>
    %11 = arith.maximumf %9, %10 : vector<20x1024xf32>
    %cst_9 = arith.constant dense<0.000000e+00> : vector<20x1024xf32>
    %12 = tpu.matmul %2, %11, %cst_9 {dimension_numbers = #tpu.dot_dimension_numbers<[1], [0], [0], [1], [0, 0, 1, 1], [], []>} : vector<20x20xf32>, vector<20x1024xf32>, vector<20x1024xf32> -> vector<20x1024xf32>
    %13 = vector.broadcast %4 : vector<20x1xf32> to vector<20x1024xf32>
    %14 = arith.addf %12, %13 : vector<20x1024xf32>
    %cst_10 = arith.constant 0.000000e+00 : f32
    %15 = vector.broadcast %cst_10 : f32 to vector<20x1024xf32>
    %16 = arith.maximumf %14, %15 : vector<20x1024xf32>
    %17 = vector.broadcast %5 : vector<20x1xf32> to vector<20x1024xf32>
    %18 = arith.mulf %17, %16 : vector<20x1024xf32>
    %cst_11 = arith.constant dense<0.000000e+00> : vector<1024xf32>
    %19 = vector.multi_reduction <add>, %18, %cst_11 [0] : vector<20x1024xf32> to vector<1024xf32>
    %20 = vector.shape_cast %19 : vector<1024xf32> to vector<1x1024xf32>
    %21 = vector.broadcast %6 : vector<1x1xf32> to vector<1x1024xf32>
    %22 = arith.addf %20, %21 : vector<1x1024xf32>
    %c0_12 = arith.constant 0 : index
    %c0_13 = arith.constant 0 : index
    %23 = vector.load %arg3[%c0_12, %c0_13] : memref<1x1024xf32, #tpu.memory_space<vmem>>, vector<1x1024xf32>
    tpu.vector_store %arg3[%c0_12, %c0_13], %22 {strides = array<i32>} : memref<1x1024xf32, #tpu.memory_space<vmem>>, vector<1x1024xf32>,
    return
  }
  func.func @transform_0(%arg0: i32) -> (i32, i32) {
    %c0_i32 = arith.constant 0 : i32
    %c0_i32_0 = arith.constant 0 : i32
    return %c0_i32, %arg0 : i32, i32
  }
  func.func @transform_1(%arg0: i32) -> (i32, i32) {
    %c0_i32 = arith.constant 0 : i32
    %c0_i32_0 = arith.constant 0 : i32
    %c0_i32_1 = arith.constant 0 : i32
    return %c0_i32, %c0_i32_0 : i32, i32
  }
  func.func @transform_2(%arg0: i32) -> (i32, i32) {
    %c0_i32 = arith.constant 0 : i32
    %c0_i32_0 = arith.constant 0 : i32
    return %c0_i32, %arg0 : i32, i32
  }
}

</mosaic_0001>

<bundles_post_ra>
// kernel: tpu_custom_call.1
= control target key start
LH: loop header
LB: loop body
LE: loop exit
PB: predicated region body
PF: predicated region fallthrough
CT: control target
= control target key end

     0   :  { %7 = vsyncpa [#allocation3], 0  ;;  %s1493_s0 = inlined_call_operand.hbm [shape: f32[12,1024], index: 0, kind: input, shape index: {}]   ;;  %s1494_s1 = inlined_call_operand.hbm [shape: f32[20,36], index: 1, kind: input, shape index: {}]   ;;  %s1495_s2 = inlined_call_operand.hbm [shape: f32[1,1024], index: 2, kind: output, shape index: {}]  }
   0x1   :  { %8 = vsyncpa [#allocation6], 0 }
   0x2   :  { %9 = vsyncpa [#allocation4], 0  ;;  %s1238_s9 = smov [#allocation2]   ;;  %s1166_s13 = scalar_lea.hbm %s1493_s0, 2048 }
   0x3   :  { %s15_s10 = sshll.u32 %s1238_s9, 4  ;;  %p1167_p0 = scmp.ne.s32.totalorder %s1493_s0, %s1166_s13  ;;  %s16_s10 = int_to_ptr.vmem [resolvable:$true] %s15_s10 }
   0x4   :  { %p1170_p1 = scmp.lt.u32.totalorder %s1166_s13, %s1493_s0 }
   0x6   :  { %p1172_p2 = pnand %p1170_p1, %p1167_p0 }
   0x8   :  { %1175 = shalt.err (!%p1172_p2)
}
   0x9   :  { %s1176_s18 = scalar_lea.vmem %s16_s10, 2048  ;;  %p1181_p4 = scmp.lt.s32.totalorder %s16_s10, %s16_s10 }
   0xa   :  { %p1177_p3 = scmp.ne.s32.totalorder %s16_s10, %s1176_s18  ;;  %p1182_p5 = scmp.lt.s32.totalorder %s1176_s18, %s1176_s18 }
   0xc   :  { %p1183_p6 = por %p1182_p5, %p1181_p4 }
   0xe   :  { %p1184_p7 = pnand %p1183_p6, %p1177_p3 }
  0x10   :  { %1187 = shalt.err (!%p1184_p7)
}
  0x11   :  { %s1239_s19 = smov 1024   ;;  %s1240_s20 = smov 64  }
  0x12   :  { %21 = dma.hbm_to_vmem [thread:$0]  %s1493_s0, 2048, %s16_s10, [#allocation3], %s1239_s19, %s1239_s19, %s1240_s20  }
  0x13   :  { %s1241_s23 = smov [#allocation5]   ;;  %s1188_s27 = scalar_lea.hbm %s1494_s1, 384 }
  0x14   :  { %s27_s24 = sshll.u32 %s1241_s23, 4  ;;  %p1189_p8 = scmp.ne.s32.totalorder %s1494_s1, %s1188_s27  ;;  %s28_s24 = int_to_ptr.vmem [resolvable:$true] %s27_s24 }
  0x15   :  { %p1192_p9 = scmp.lt.u32.totalorder %s1188_s27, %s1494_s1 }
  0x17   :  { %p1194_p10 = pnand %p1192_p9, %p1189_p8 }
  0x19   :  { %1197 = shalt.err (!%p1194_p10)
}
  0x1a   :  { %s1198_s4 = scalar_lea.vmem %s28_s24, 384  ;;  %p1203_p12 = scmp.lt.s32.totalorder %s28_s24, %s28_s24 }
  0x1b   :  { %p1199_p11 = scmp.ne.s32.totalorder %s28_s24, %s1198_s4  ;;  %p1204_p13 = scmp.lt.s32.totalorder %s1198_s4, %s1198_s4 }
  0x1d   :  { %p1205_p0 = por %p1204_p13, %p1203_p12 }
  0x1f   :  { %p1206_p1 = pnand %p1205_p0, %p1199_p11 }
  0x21   :  { %1209 = shalt.err (!%p1206_p1)
}
  0x22   :  { %s1242_s0 = smov 128   ;;  %s1243_s5 = smov 8  }
  0x23   :  { %33 = dma.hbm_to_vmem [thread:$0]  %s1494_s1, 384, %s28_s24, [#allocation6], %s1242_s0, %s1242_s0, %s1243_s5  }
  0x24   :  { %1232 = dma.done.wait [#allocation3], 2048  }
  0x25   :  { %1233 = vsyncadd [#allocation3], 4294965248 }
  0x26   :  { %1234 = dma.done.wait [#allocation6], 384  }
  0x27   :  { %1235 = vsyncadd [#allocation6], 4294966912  ;;  %v1244_v0 = vmov 0.0   ;;  %v1245_v1 = vmov 32   ;;  %vm82_vm0 = vcmask 1043456   ;;  %vm1246_vm1 = vmmov 1  }
  0x28   :  { %171 = vmatprep.mubr.f32.mxu0 %v1244_v0  ;;  %254 = vmatprep.mubr.f32.mxu1 %v1244_v0  ;;  %vm1295_vm2 = vmpackc.low %vm82_vm0, %vm1246_vm1  ;;  %v41_v3 = vld [vmem:[#allocation2 + $0x8] sm:$0xff]  ;;  %v43_v5 = vld [vmem:[#allocation2 + $0x18] sm:$0xff]  ;;  %vm75_vm3 = vcmask 97280   ;;  %s1247_s1 = smov 116   ;;  %v1248_v30 = vmov 33   ;;  %v1249_v31 = vmov 34  }
  0x29   :  { %1159 = vset.pattern.permute.xlu0 %v1245_v1  ;;  %1160 = vset.pattern.permute.xlu1 %v1245_v1  ;;  %v49_v4 = vld [vmem:[#allocation2 + $0x48] sm:$0xf]  ;;  %v51_v7 = vld [vmem:[#allocation2 + $0x58] sm:$0xf]  ;;  %v40_v8 = vld [vmem:[#allocation2] sm:$0xff]  ;;  %v1250_v33 = vmov 35  }
  0x2a   :  { %v1104_v6 = vpack.c.bf16 %v49_v4, %v41_v3  ;;  %v48_v9 = vld [vmem:[#allocation2 + $0x40] sm:$0xf]  ;;  %v1110_v10 = vpack.c.bf16 %v51_v7, %v43_v5  ;;  %v42_v12 = vld [vmem:[#allocation2 + $0x10] sm:$0xff]  ;;  %v45_v16 = vld [vmem:[#allocation2 + $0x28] sm:$0xff]  ;;  %vm481_vm4 = vcmask 162816   ;;  %s1252_s8 = smov [#allocation7]  }
  0x2b   :  { %v1107_v11 = vpack.c.bf16 %v48_v9, %v40_v8  ;;  %v50_v13 = vld [vmem:[#allocation2 + $0x50] sm:$0xf]  ;;  %v1299_v14 = vld [vmem:[#allocation5] sm:$0xff]  ;;  %v53_v17 = vld [vmem:[#allocation2 + $0x68] sm:$0xf]  ;;  %s1054_s9 = sshll.u32 %s1252_s8, 4  ;;  %s1055_s9 = int_to_ptr.vmem [resolvable:$true] %s1054_s9 }
  0x2c   :  { %1106 = vmatprep.subr.msk.bf16.mxu0 %vm1295_vm2, %v1104_v6  ;;  %v1113_v15 = vpack.c.bf16 %v50_v13, %v42_v12  ;;  %62 = vperm.xlu0 %1159, %v1299_v14   ;;  %v1116_v18 = vpack.c.bf16 %v53_v17, %v45_v16  ;;  %v47_v19 = vld [vmem:[#allocation2 + $0x38] sm:$0xff]  ;;  %v44_v21 = vld [vmem:[#allocation2 + $0x20] sm:$0xff]  ;;  %v46_v24 = vld [vmem:[#allocation2 + $0x30] sm:$0xff]  ;;  %s1210_s10 = scalar_lea.vmem %s1055_s9, 128  ;;  %p1215_p3 = scmp.lt.s32.totalorder %s1055_s9, %s1055_s9 }
  0x2d   :  { %1112 = vmatprep.subr.msk.bf16.mxu1 %vm1295_vm2, %v1110_v10  ;;  %1109 = vmatpush1.bf16.msk.msra.mxu0 %vm1295_vm2, %v1107_v11  ;;  %v55_v20 = vld [vmem:[#allocation2 + $0x78] sm:$0xf]  ;;  %v52_v23 = vld [vmem:[#allocation2 + $0x60] sm:$0xf]  ;;  %v54_v25 = vld [vmem:[#allocation2 + $0x70] sm:$0xf]  ;;  %p1211_p2 = scmp.ne.s32.totalorder %s1055_s9, %s1210_s10  ;;  %p1216_p4 = scmp.lt.s32.totalorder %s1210_s10, %s1210_s10 }
  0x2e   :  { %1115 = vmatpush1.bf16.msk.msra.mxu1 %vm1295_vm2, %v1113_v15  ;;  %v1122_v22 = vpack.c.bf16 %v55_v20, %v47_v19  ;;  %1118 = vmatprep.subr.msk.bf16.mxu0 %vm1295_vm2, %v1116_v18  ;;  %v1119_v26 = vpack.c.bf16 %v52_v23, %v44_v21  ;;  %v1125_v27 = vpack.c.bf16 %v54_v25, %v46_v24  ;;  %v57_v28 = vld [vmem:[#allocation5 + $0x8] sm:$0xff]  ;;  %v58_v29 = vld [vmem:[#allocation5 + $0x10] sm:$0xf]  ;;  %v59_v32 = vld [vmem:[#allocation5] sm:$0x1] }
  0x2f   :  { %72 = vperm.xlu1 %1160, %v58_v29   ;;  %p1217_p5 = por %p1216_p4, %p1215_p3 }
  0x30   :  { %1066 = vmatmul.mubr.msk.f32.vlgmr.msra.gmra.mrb[0].mxu0 %vm75_vm3, %v1299_v14  ;;  %1124 = vmatprep.subr.msk.bf16.mxu1 %vm1295_vm2, %v1122_v22 }
  0x31   :  { %1071 = vmatmul.mubr.msk.f32.vlgmr.msra.gmra.mrb[0].mxu1 %vm75_vm3, %v1299_v14  ;;  %177 = vmatprep.mubr.f32.mxu0 %v1244_v0  ;;  %p1218_p6 = pnand %p1217_p5, %p1211_p2 }
  0x32   :  { %260 = vmatprep.mubr.f32.mxu1 %v1244_v0  ;;  %1121 = vmatpush1.bf16.msk.msra.mxu0 %vm1295_vm2, %v1119_v26 }
  0x33   :  { %1127 = vmatpush1.bf16.msk.msra.mxu1 %vm1295_vm2, %v1125_v27  ;;  %67 = vperm.xlu0 %1159, %v57_v28  }
  0x34   :  { %1067 = vmatmul.mubr.msk.f32.gmra.mrb[2].mxu0 %vm75_vm3, %v57_v28  ;;  %475 = vrot.lane.b32.xlu1 %v1299_v14, %s1247_s1 }
  0x35   :  { %1072 = vmatmul.mubr.msk.f32.gmra.mrb[2].mxu1 %vm75_vm3, %v57_v28  ;;  %183 = vmatprep.mubr.f32.mxu0 %v1244_v0 }
  0x36   :  { %266 = vmatprep.mubr.f32.mxu1 %v1244_v0  ;;  %1162 = vset.pattern.permute.xlu1 %v1248_v30 }
  0x37   :  { %477 = vrot.lane.b32.xlu0 %v57_v28, %s1247_s1 }
  0x38   :  { %1068 = vmatmul.mubr.msk.f32.gmra.mrb[4].mxu0 %vm75_vm3, %v58_v29  ;;  %479 = vrot.lane.b32.xlu1 %v58_v29, %s1247_s1 }
  0x39   :  { %1073 = vmatmul.mubr.msk.f32.gmra.mrb[4].mxu1 %vm75_vm3, %v58_v29  ;;  %337 = vmatprep.mubr.f32.mxu0 %v1244_v0 }
  0x3a   :  { %420 = vmatprep.mubr.f32.mxu1 %v1244_v0  ;;  %1161 = vset.pattern.permute.xlu0 %v1248_v30 }
  0x3b   :  { %464 = vperm.xlu0 %1161, %v1299_v14  }
  0x3c   :  { %1076 = vmatmul.mubr.msk.f32.vlgmr.msra.gmra.mrb[6].mxu0 %vm75_vm3, %v1299_v14  ;;  %468 = vperm.xlu1 %1162, %v57_v28  }
  0x3d   :  { %1081 = vmatmul.mubr.msk.f32.vlgmr.msra.gmra.mrb[6].mxu1 %vm75_vm3, %v1299_v14  ;;  %343 = vmatprep.mubr.f32.mxu0 %v1244_v0 }
  0x3e   :  { %426 = vmatprep.mubr.f32.mxu1 %v1244_v0 }
  0x3f   :  { %1163 = vset.pattern.permute.xlu0 %v1249_v31 }
  0x40   :  { %1077 = vmatmul.mubr.msk.f32.gmra.mrb[8].mxu0 %vm75_vm3, %v57_v28  ;;  %472 = vperm.xlu1 %1162, %v58_v29  }
  0x41   :  { %1082 = vmatmul.mubr.msk.f32.gmra.mrb[8].mxu1 %vm75_vm3, %v57_v28  ;;  %349 = vmatprep.mubr.f32.mxu0 %v1244_v0 }
  0x42   :  { %432 = vmatprep.mubr.f32.mxu1 %v1244_v0  ;;  %869 = vperm.xlu0 %1163, %v1299_v14  }
  0x44   :  { %1078 = vmatmul.mubr.msk.f32.gmra.mrb[10].mxu0 %vm75_vm3, %v58_v29  ;;  %1164 = vset.pattern.permute.xlu1 %v1249_v31 }
  0x45   :  { %1083 = vmatmul.mubr.msk.f32.gmra.mrb[10].mxu1 %vm75_vm3, %v58_v29  ;;  %576 = vmatprep.mubr.f32.mxu0 %v1244_v0 }
  0x46   :  { %659 = vmatprep.mubr.f32.mxu1 %v1244_v0  ;;  %873 = vperm.xlu1 %1164, %v57_v28  }
  0x47   :  { %1165 = vset.pattern.permute.xlu0 %v1250_v33 }
  0x48   :  { %978 = vperm.xlu0 %1165, %v59_v32  }
  0x4a   :  { %877 = vperm.xlu1 %1164, %v58_v29  }
  0xab   :  { %v63_v34 = vpop.permute.xlu0 %62 }
  0xae   :  { %v1355_v54 = vpop.permute.xlu1 %72 }
  0xb2   :  { %v1349_v41 = vpop.permute.xlu0 %67  ;;  %v1363_v18 = vpop.permute.xlu1 %475 }
  0xb6   :  { %v478_v33 = vpop.permute.xlu0 %477 }
 0x103   :  { %v173_v35 = vpop.f32.mrb[0].mxu0 }
 0x104   :  { %v256_v36 = vpop.f32.mrb[0].mxu1  ;;  %v175_v37 = vpop.f32.mrb[1].mxu0  ;;  %v174_v39 = vadd.f32 %v173_v35, %v63_v34 }
 0x105   :  { %v258_v38 = vpop.f32.mrb[1].mxu1  ;;  %v257_v40 = vadd.f32 %v256_v36, %v63_v34  ;;  %v176_v42 = vadd.f32 %v175_v37, %v63_v34 }
 0x106   :  { %v259_v44 = vadd.f32 %v258_v38, %v63_v34  ;;  %v439_v51 = vmax.f32 %v174_v39, 0.0 }
 0x107   :  { %v179_v43 = vpop.f32.mrb[2].mxu0  ;;  %v441_v55 = vmax.f32 %v257_v40, 0.0  ;;  %v440_v56 = vmax.f32 %v176_v42, 0.0 }
 0x108   :  { %v180_v45 = vadd.f32 %v179_v43, %v1349_v41  ;;  %v262_v46 = vpop.f32.mrb[2].mxu1  ;;  %v181_v47 = vpop.f32.mrb[3].mxu0  ;;  %v442_v60 = vmax.f32 %v259_v44, 0.0 }
 0x109   :  { %v263_v48 = vadd.f32 %v262_v46, %v1349_v41  ;;  %v182_v49 = vadd.f32 %v181_v47, %v1349_v41  ;;  %v264_v50 = vpop.f32.mrb[3].mxu1 }
 0x10a   :  { %v447_v52 = vmax.f32 %v180_v45, 0.0  ;;  %v265_v53 = vadd.f32 %v264_v50, %v1349_v41 }
 0x10b   :  { %v449_v57 = vmax.f32 %v263_v48, 0.0  ;;  %v448_v58 = vmax.f32 %v182_v49, 0.0  ;;  %v185_v59 = vpop.f32.mrb[4].mxu0 }
 0x10c   :  { %v1130_v61 = vpack.c.bf16 %v447_v52, %v439_v51  ;;  %v450_v62 = vmax.f32 %v265_v53, 0.0  ;;  %v268_v63 = vpop.f32.mrb[4].mxu1  ;;  %v187_v1 = vpop.f32.mrb[5].mxu0  ;;  %v186_v7 = vadd.f32 %v185_v59, %v1355_v54 }
 0x10d   :  { %v1134_v2 = vpack.c.bf16 %v449_v57, %v441_v55  ;;  %v1128_v3 = vpack.c.bf16 %v448_v58, %v440_v56  ;;  %v188_v4 = vadd.f32 %v187_v1, %v1355_v54  ;;  %v270_v5 = vpop.f32.mrb[5].mxu1  ;;  %v269_v9 = vadd.f32 %v268_v63, %v1355_v54  ;;  %v480_v51 = vpop.permute.xlu1 %479 }
 0x10e   :  { %v1132_v6 = vpack.c.bf16 %v450_v62, %v442_v60  ;;  %v271_v8 = vadd.f32 %v270_v5, %v1355_v54  ;;  %v455_v16 = vmax.f32 %v186_v7, 0.0  ;;  %v1407_v58 = vpop.permute.xlu0 %464 }
 0x10f   :  { %v456_v10 = vmax.f32 %v188_v4, 0.0  ;;  %v339_v11 = vpop.f32.mrb[6].mxu0  ;;  %1129 = vmatprep.subr.bf16.mxu0 %v1128_v3  ;;  %v457_v19 = vmax.f32 %v269_v9, 0.0  ;;  %v1251_v3 = vmov 1966171168  }
 0x110   :  { %v458_v12 = vmax.f32 %v271_v8, 0.0  ;;  %v422_v13 = vpop.f32.mrb[6].mxu1  ;;  %1133 = vmatprep.subr.bf16.mxu1 %v1132_v6  ;;  %v341_v14 = vpop.f32.mrb[7].mxu0  ;;  %1131 = vmatpush1.bf16.msra.mxu0 %v1130_v61  ;;  %v340_v17 = vadd.f32 %v339_v11, %v63_v34  ;;  %v1414_v4 = vunpack.c.l.s4 %v1251_v3  ;;  %v1004_v8 = vlaneseq }
 0x111   :  { %v424_v15 = vpop.f32.mrb[7].mxu1  ;;  %1135 = vmatpush1.bf16.msra.mxu1 %v1134_v2  ;;  %1084 = vmatprep.subr.msk.mxu0 %vm82_vm0, %v456_v10  ;;  %v423_v20 = vadd.f32 %v422_v13, %v63_v34  ;;  %v342_v21 = vadd.f32 %v341_v14, %v63_v34 }
 0x112   :  { %1089 = vmatprep.subr.msk.mxu1 %vm82_vm0, %v458_v12  ;;  %v425_v23 = vadd.f32 %v424_v15, %v63_v34  ;;  %v443_v30 = vmax.f32 %v340_v17, 0.0  ;;  %v1417_v7 = vpop.permute.xlu0 %869 }
 0x113   :  { %v345_v22 = vpop.f32.mrb[8].mxu0  ;;  %v445_v34 = vmax.f32 %v423_v20, 0.0  ;;  %v444_v35 = vmax.f32 %v342_v21, 0.0  ;;  %v1003_v20 = vunpack.c.0.s8 %v1414_v4 }
 0x114   :  { %v346_v24 = vadd.f32 %v345_v22, %v1349_v41  ;;  %v428_v25 = vpop.f32.mrb[8].mxu1  ;;  %v347_v26 = vpop.f32.mrb[9].mxu0  ;;  %1085 = vmatpush1.msk.msra.mxu0 %vm82_vm0, %v455_v16  ;;  %v446_v39 = vmax.f32 %v425_v23, 0.0 }
 0x115   :  { %v429_v27 = vadd.f32 %v428_v25, %v1349_v41  ;;  %v348_v28 = vadd.f32 %v347_v26, %v1349_v41  ;;  %v430_v29 = vpop.f32.mrb[9].mxu1  ;;  %1090 = vmatpush1.msk.msra.mxu1 %vm82_vm0, %v457_v19  ;;  %1086 = vmatmul.mubr.msk.f32.vlgmr.msra.gmra.mrb[12].mxu0 %vm481_vm4, %v1363_v18 }
 0x116   :  { %v451_v31 = vmax.f32 %v346_v24, 0.0  ;;  %v431_v32 = vadd.f32 %v430_v29, %v1349_v41  ;;  %1091 = vmatmul.mubr.msk.f32.vlgmr.msra.gmra.mrb[12].mxu1 %vm481_vm4, %v1363_v18  ;;  %582 = vmatprep.mubr.f32.mxu0 %v1244_v0  ;;  %v1427_v24 = vshrl.u32 %v1004_v8, 7 }
 0x117   :  { %v453_v36 = vmax.f32 %v429_v27, 0.0  ;;  %v452_v37 = vmax.f32 %v348_v28, 0.0  ;;  %v351_v38 = vpop.f32.mrb[10].mxu0  ;;  %665 = vmatprep.mubr.f32.mxu1 %v1244_v0 }
 0x118   :  { %v1138_v40 = vpack.c.bf16 %v451_v31, %v443_v30  ;;  %v454_v42 = vmax.f32 %v431_v32, 0.0  ;;  %v434_v43 = vpop.f32.mrb[10].mxu1  ;;  %v353_v44 = vpop.f32.mrb[11].mxu0  ;;  %v352_v49 = vadd.f32 %v351_v38, %v1355_v54 }
 0x119   :  { %v1142_v45 = vpack.c.bf16 %v453_v36, %v445_v34  ;;  %v1136_v41 = vpack.c.bf16 %v452_v37, %v444_v35  ;;  %v354_v46 = vadd.f32 %v353_v44, %v1355_v54  ;;  %v436_v47 = vpop.f32.mrb[11].mxu1  ;;  %1087 = vmatmul.mubr.msk.f32.gmra.mrb[14].mxu0 %vm481_vm4, %v478_v33  ;;  %v435_v52 = vadd.f32 %v434_v43, %v1355_v54 }
 0x11a   :  { %v1140_v48 = vpack.c.bf16 %v454_v42, %v446_v39  ;;  %v437_v50 = vadd.f32 %v436_v47, %v1355_v54  ;;  %1092 = vmatmul.mubr.msk.f32.gmra.mrb[14].mxu1 %vm481_vm4, %v478_v33  ;;  %588 = vmatprep.mubr.f32.mxu0 %v1244_v0  ;;  %v459_v56 = vmax.f32 %v352_v49, 0.0  ;;  %v1405_v54 = vpop.permute.xlu1 %468 }
 0x11b   :  { %v460_v53 = vmax.f32 %v354_v46, 0.0  ;;  %1137 = vmatprep.subr.bf16.mxu0 %v1136_v41  ;;  %671 = vmatprep.mubr.f32.mxu1 %v1244_v0  ;;  %v461_v57 = vmax.f32 %v435_v52, 0.0 }
 0x11c   :  { %v462_v55 = vmax.f32 %v437_v50, 0.0  ;;  %1141 = vmatprep.subr.bf16.mxu1 %v1140_v48  ;;  %1139 = vmatpush1.bf16.msra.mxu0 %v1138_v40 }
 0x11d   :  { %1143 = vmatpush1.bf16.msra.mxu1 %v1142_v45  ;;  %1088 = vmatmul.mubr.msk.f32.gmra.mrb[16].mxu0 %vm481_vm4, %v480_v51 }
 0x11e   :  { %1093 = vmatmul.mubr.msk.f32.gmra.mrb[16].mxu1 %vm481_vm4, %v480_v51  ;;  %1094 = vmatprep.subr.msk.mxu0 %vm82_vm0, %v460_v53  ;;  %v1409_v59 = vpop.permute.xlu1 %472 }
 0x11f   :  { %1099 = vmatprep.subr.msk.mxu1 %vm82_vm0, %v462_v55  ;;  %742 = vmatprep.mubr.f32.mxu0 %v1244_v0 }
 0x120   :  { %1095 = vmatpush1.msk.msra.mxu0 %vm82_vm0, %v459_v56  ;;  %825 = vmatprep.mubr.f32.mxu1 %v1244_v0 }
 0x121   :  { %1100 = vmatpush1.msk.msra.mxu1 %vm82_vm0, %v461_v57  ;;  %1096 = vmatmul.mubr.msk.f32.vlgmr.msra.gmra.mrb[18].mxu0 %vm481_vm4, %v1363_v18 }
 0x122   :  { %1101 = vmatmul.mubr.msk.f32.vlgmr.msra.gmra.mrb[18].mxu1 %vm481_vm4, %v1363_v18  ;;  %748 = vmatprep.mubr.f32.mxu0 %v1244_v0  ;;  %v1419_v12 = vpop.permute.xlu1 %873 }
 0x123   :  { %831 = vmatprep.mubr.f32.mxu1 %v1244_v0 }
 0x125   :  { %1097 = vmatmul.mubr.msk.f32.gmra.mrb[20].mxu0 %vm481_vm4, %v478_v33 }
 0x126   :  { %1102 = vmatmul.mubr.msk.f32.gmra.mrb[20].mxu1 %vm481_vm4, %v478_v33  ;;  %754 = vmatprep.mubr.f32.mxu0 %v1244_v0  ;;  %v1438_v42 = vpop.permute.xlu1 %877 }
 0x127   :  { %837 = vmatprep.mubr.f32.mxu1 %v1244_v0 }
 0x129   :  { %1098 = vmatmul.mubr.msk.f32.gmra.mrb[22].mxu0 %vm481_vm4, %v480_v51 }
 0x12a   :  { %1103 = vmatmul.mubr.msk.f32.gmra.mrb[22].mxu1 %vm481_vm4, %v480_v51 }
 0x1e8   :  { %v578_v60 = vpop.f32.mrb[12].mxu0 }
 0x1e9   :  { %v661_v61 = vpop.f32.mrb[12].mxu1  ;;  %v580_v62 = vpop.f32.mrb[13].mxu0  ;;  %v579_v63 = vadd.f32 %v578_v60, %v1407_v58 }
 0x1ea   :  { %v663_v1 = vpop.f32.mrb[13].mxu1  ;;  %v581_v2 = vadd.f32 %v580_v62, %v1407_v58  ;;  %v662_v0 = vadd.f32 %v661_v61, %v1407_v58 }
 0x1eb   :  { %v664_v5 = vadd.f32 %v663_v1, %v1407_v58  ;;  %v844_v6 = vmax.f32 %v579_v63, 0.0 }
 0x1ec   :  { %v584_v9 = vpop.f32.mrb[14].mxu0  ;;  %v845_v10 = vmax.f32 %v581_v2, 0.0  ;;  %v846_v11 = vmax.f32 %v662_v0, 0.0 }
 0x1ed   :  { %v585_v13 = vadd.f32 %v584_v9, %v1405_v54  ;;  %v667_v14 = vpop.f32.mrb[14].mxu1  ;;  %v847_v15 = vmax.f32 %v664_v5, 0.0  ;;  %v586_v16 = vpop.f32.mrb[15].mxu0  ;;  %v880_v23 = vmul.f32 %v1417_v7, %v844_v6 }
 0x1ee   :  { %v668_v17 = vadd.f32 %v667_v14, %v1405_v54  ;;  %v587_v18 = vadd.f32 %v586_v16, %v1405_v54  ;;  %v669_v19 = vpop.f32.mrb[15].mxu1  ;;  %v881_v28 = vmul.f32 %v1417_v7, %v845_v10  ;;  %v882_v29 = vmul.f32 %v1417_v7, %v846_v11 }
 0x1ef   :  { %v852_v21 = vmax.f32 %v585_v13, 0.0  ;;  %v670_v22 = vadd.f32 %v669_v19, %v1405_v54  ;;  %v883_v35 = vmul.f32 %v1417_v7, %v847_v15 }
 0x1f0   :  { %v854_v25 = vmax.f32 %v668_v17, 0.0  ;;  %v853_v26 = vmax.f32 %v587_v18, 0.0  ;;  %v590_v27 = vpop.f32.mrb[16].mxu0 }
 0x1f1   :  { %v855_v30 = vmax.f32 %v670_v22, 0.0  ;;  %v888_v31 = vmul.f32 %v1419_v12, %v852_v21  ;;  %v591_v32 = vadd.f32 %v590_v27, %v1409_v59  ;;  %v673_v33 = vpop.f32.mrb[16].mxu1  ;;  %v592_v34 = vpop.f32.mrb[17].mxu0 }
 0x1f2   :  { %v889_v36 = vmul.f32 %v1419_v12, %v853_v26  ;;  %v890_v37 = vmul.f32 %v1419_v12, %v854_v25  ;;  %v674_v38 = vadd.f32 %v673_v33, %v1409_v59  ;;  %v593_v39 = vadd.f32 %v592_v34, %v1409_v59  ;;  %v675_v40 = vpop.f32.mrb[17].mxu1 }
 0x1f3   :  { %v891_v43 = vmul.f32 %v1419_v12, %v855_v30  ;;  %v860_v44 = vmax.f32 %v591_v32, 0.0  ;;  %v676_v45 = vadd.f32 %v675_v40, %v1409_v59  ;;  %v904_v41 = vadd.f32 %v888_v31, %v880_v23 }
 0x1f4   :  { %v862_v46 = vmax.f32 %v674_v38, 0.0  ;;  %v861_v47 = vmax.f32 %v593_v39, 0.0  ;;  %v913_v48 = vadd.f32 %v889_v36, %v881_v28  ;;  %v922_v49 = vadd.f32 %v890_v37, %v882_v29  ;;  %v744_v50 = vpop.f32.mrb[18].mxu0 }
 0x1f5   :  { %v863_v51 = vmax.f32 %v676_v45, 0.0  ;;  %v896_v52 = vmul.f32 %v1438_v42, %v860_v44  ;;  %v931_v53 = vadd.f32 %v891_v43, %v883_v35  ;;  %v745_v55 = vadd.f32 %v744_v50, %v1407_v58  ;;  %v827_v56 = vpop.f32.mrb[18].mxu1  ;;  %v746_v57 = vpop.f32.mrb[19].mxu0 }
 0x1f6   :  { %v897_v60 = vmul.f32 %v1438_v42, %v861_v47  ;;  %v898_v61 = vmul.f32 %v1438_v42, %v862_v46  ;;  %v828_v62 = vadd.f32 %v827_v56, %v1407_v58  ;;  %v747_v63 = vadd.f32 %v746_v57, %v1407_v58  ;;  %v829_v1 = vpop.f32.mrb[19].mxu1 }
 0x1f7   :  { %v899_v2 = vmul.f32 %v1438_v42, %v863_v51  ;;  %v905_v0 = vsel %vm82_vm0, %v896_v52, 0.0  ;;  %v848_v3 = vmax.f32 %v745_v55, 0.0  ;;  %v830_v5 = vadd.f32 %v829_v1, %v1407_v58 }
 0x1f8   :  { %v906_v6 = vadd.f32 %v905_v0, %v904_v41  ;;  %v914_v8 = vsel %vm82_vm0, %v897_v60, 0.0  ;;  %v923_v9 = vsel %vm82_vm0, %v898_v61, 0.0  ;;  %v850_v10 = vmax.f32 %v828_v62, 0.0  ;;  %v750_v11 = vpop.f32.mrb[20].mxu0 }
 0x1f9   :  { %v915_v13 = vadd.f32 %v914_v8, %v913_v48  ;;  %v924_v14 = vadd.f32 %v923_v9, %v922_v49  ;;  %v932_v15 = vsel %vm82_vm0, %v899_v2, 0.0  ;;  %v884_v16 = vmul.f32 %v1417_v7, %v848_v3  ;;  %v833_v17 = vpop.f32.mrb[20].mxu1  ;;  %v752_v18 = vpop.f32.mrb[21].mxu0 }
 0x1fa   :  { %v907_v19 = vrot.slane %v906_v6, 4  ;;  %v933_v21 = vadd.f32 %v932_v15, %v931_v53  ;;  %v886_v22 = vmul.f32 %v1417_v7, %v850_v10  ;;  %v849_v58 = vmax.f32 %v747_v63, 0.0  ;;  %v835_v23 = vpop.f32.mrb[21].mxu1 }
 0x1fb   :  { %v916_v25 = vrot.slane %v915_v13, 4  ;;  %v925_v26 = vrot.slane %v924_v14, 4  ;;  %v851_v27 = vmax.f32 %v830_v5, 0.0  ;;  %v751_v28 = vadd.f32 %v750_v11, %v1405_v54 }
 0x1fc   :  { %v934_v29 = vrot.slane %v933_v21, 4  ;;  %v885_v30 = vmul.f32 %v1417_v7, %v849_v58  ;;  %v834_v31 = vadd.f32 %v833_v17, %v1405_v54  ;;  %v753_v32 = vadd.f32 %v752_v18, %v1405_v54  ;;  %v756_v33 = vpop.f32.mrb[22].mxu0 }
 0x1fd   :  { %v887_v34 = vmul.f32 %v1417_v7, %v851_v27  ;;  %v856_v35 = vmax.f32 %v751_v28, 0.0  ;;  %v836_v36 = vadd.f32 %v835_v23, %v1405_v54  ;;  %v757_v37 = vadd.f32 %v756_v33, %v1409_v59  ;;  %v839_v38 = vpop.f32.mrb[22].mxu1  ;;  %v758_v39 = vpop.f32.mrb[23].mxu0 }
 0x1fe   :  { %v858_v40 = vmax.f32 %v834_v31, 0.0  ;;  %v857_v43 = vmax.f32 %v753_v32, 0.0  ;;  %v840_v44 = vadd.f32 %v839_v38, %v1409_v59  ;;  %v759_v45 = vadd.f32 %v758_v39, %v1409_v59  ;;  %v841_v41 = vpop.f32.mrb[23].mxu1 }
 0x1ff   :  { %v892_v46 = vmul.f32 %v1419_v12, %v856_v35  ;;  %v859_v47 = vmax.f32 %v836_v36, 0.0  ;;  %v864_v48 = vmax.f32 %v757_v37, 0.0  ;;  %v842_v7 = vadd.f32 %v841_v41, %v1409_v59 }
 0x200   :  { %v894_v49 = vmul.f32 %v1419_v12, %v858_v40  ;;  %v893_v54 = vmul.f32 %v1419_v12, %v857_v43  ;;  %v866_v50 = vmax.f32 %v840_v44, 0.0  ;;  %v865_v51 = vmax.f32 %v759_v45, 0.0 }
 0x201   :  { %v940_v52 = vadd.f32 %v892_v46, %v884_v16  ;;  %v895_v53 = vmul.f32 %v1419_v12, %v859_v47  ;;  %v900_v55 = vmul.f32 %v1438_v42, %v864_v48  ;;  %v867_v56 = vmax.f32 %v842_v7, 0.0 }
 0x202   :  { %v958_v57 = vadd.f32 %v894_v49, %v886_v22  ;;  %v949_v60 = vadd.f32 %v893_v54, %v885_v30  ;;  %v902_v61 = vmul.f32 %v1438_v42, %v866_v50  ;;  %v901_v62 = vmul.f32 %v1438_v42, %v865_v51 }
 0x203   :  { %v967_v63 = vadd.f32 %v895_v53, %v887_v34  ;;  %v941_v59 = vsel %vm82_vm0, %v900_v55, 0.0  ;;  %v903_v1 = vmul.f32 %v1438_v42, %v867_v56  ;;  %v908_v2 = vadd.f32 %v907_v19, %v906_v6  ;;  %v979_v34 = vpop.permute.xlu0 %978 }
 0x204   :  { %v942_v0 = vadd.f32 %v941_v59, %v940_v52  ;;  %v959_v3 = vsel %vm82_vm0, %v902_v61, 0.0  ;;  %v950_v12 = vsel %vm82_vm0, %v901_v62, 0.0  ;;  %v917_v5 = vadd.f32 %v916_v25, %v915_v13 }
 0x205   :  { %v960_v8 = vadd.f32 %v959_v3, %v958_v57  ;;  %v951_v9 = vadd.f32 %v950_v12, %v949_v60  ;;  %v968_v10 = vsel %vm82_vm0, %v903_v1, 0.0  ;;  %v909_v11 = vrot.slane %v908_v2, 2 }
 0x206   :  { %v943_v15 = vrot.slane %v942_v0, 4  ;;  %v969_v16 = vadd.f32 %v968_v10, %v967_v63  ;;  %v918_v17 = vrot.slane %v917_v5, 2  ;;  %v926_v18 = vadd.f32 %v925_v26, %v924_v14 }
 0x207   :  { %v961_v22 = vrot.slane %v960_v8, 4  ;;  %v952_v58 = vrot.slane %v951_v9, 4  ;;  %v910_v23 = vadd.f32 %v909_v11, %v908_v2  ;;  %v935_v42 = vadd.f32 %v934_v29, %v933_v21 }
 0x208   :  { %v944_v6 = vadd.f32 %v943_v15, %v942_v0  ;;  %v970_v19 = vrot.slane %v969_v16, 4  ;;  %v919_v27 = vadd.f32 %v918_v17, %v917_v5  ;;  %v927_v28 = vrot.slane %v926_v18, 2 }
 0x209   :  { %v962_v30 = vadd.f32 %v961_v22, %v960_v8  ;;  %v953_v31 = vadd.f32 %v952_v58, %v951_v9  ;;  %v911_v13 = vrot.slane %v910_v23, 1  ;;  %v936_v25 = vrot.slane %v935_v42, 2 }
 0x20a   :  { %v945_v32 = vrot.slane %v944_v6, 2  ;;  %v971_v33 = vadd.f32 %v970_v19, %v969_v16  ;;  %v920_v35 = vrot.slane %v919_v27, 1  ;;  %v928_v36 = vadd.f32 %v927_v28, %v926_v18 }
 0x20b   :  { %v963_v37 = vrot.slane %v962_v30, 2  ;;  %v954_v38 = vrot.slane %v953_v31, 2  ;;  %v912_v14 = vadd.f32 %v911_v13, %v910_v23  ;;  %v937_v26 = vadd.f32 %v936_v25, %v935_v42 }
 0x20c   :  { %v946_v39 = vadd.f32 %v945_v32, %v944_v6  ;;  %v972_v40 = vrot.slane %v971_v33, 2  ;;  %v921_v21 = vadd.f32 %v920_v35, %v919_v27  ;;  %v929_v29 = vrot.slane %v928_v36, 1 }
 0x20d   :  { %v964_v43 = vadd.f32 %v963_v37, %v962_v30  ;;  %v955_v44 = vadd.f32 %v954_v38, %v953_v31  ;;  %v938_v45 = vrot.slane %v937_v26, 1  ;;  %v981_v41 = vadd.f32 %v979_v34, %v912_v14 }
 0x20e   :  { %v947_v46 = vrot.slane %v946_v39, 1  ;;  %v973_v47 = vadd.f32 %v972_v40, %v971_v33  ;;  %v930_v48 = vadd.f32 %v929_v29, %v928_v36  ;;  %v982_v7 = vadd.f32 %v979_v34, %v921_v21 }
 0x20f   :  { %v965_v49 = vrot.slane %v964_v43, 1  ;;  %v956_v54 = vrot.slane %v955_v44, 1  ;;  %v939_v50 = vadd.f32 %v938_v45, %v937_v26  ;;  %v1006_v51 = vsub.s32 %v1003_v20, %v1427_v24 }
 0x210   :  { %v948_v52 = vadd.f32 %v947_v46, %v946_v39  ;;  %v974_v53 = vrot.slane %v973_v47, 1  ;;  %v983_v55 = vadd.f32 %v979_v34, %v930_v48  ;;  %v997_v56 = vcombine.low %v981_v41, %v982_v7 }
 0x211   :  { %v966_v57 = vadd.f32 %v965_v49, %v964_v43  ;;  %v957_v60 = vadd.f32 %v956_v54, %v955_v44  ;;  %v984_v61 = vadd.f32 %v979_v34, %v939_v50 }
 0x212   :  { %v975_v62 = vadd.f32 %v974_v53, %v973_v47  ;;  %v985_v63 = vadd.f32 %v979_v34, %v948_v52  ;;  %v1007_v0 = vrot.slane %v997_v56, %v1006_v51 }
 0x213   :  { %v986_v59 = vadd.f32 %v979_v34, %v957_v60  ;;  %v987_v1 = vadd.f32 %v979_v34, %v966_v57  ;;  %v998_v2 = vcombine.low %v983_v55, %v984_v61 }
 0x214   :  { %v988_v3 = vadd.f32 %v979_v34, %v975_v62 }
 0x215   :  { %v999_v12 = vcombine.low %v985_v63, %v986_v59  ;;  %v1014_v5 = vrot.slane %v998_v2, %v1006_v51 }
 0x216   :  { %v1000_v8 = vcombine.low %v987_v1, %v988_v3 }
 0x217   :  { %v1021_v9 = vrot.slane %v999_v12, %v1006_v51  ;;  %v1029_v4 = vcombine.low %v1007_v0, %v1014_v5 }
 0x218   :  { %v1028_v20 = vrot.slane %v1000_v8, %v1006_v51 }
 0x219   :  { %v1037_v10 = vrot.slane %v1029_v4, %v1006_v51 }
 0x21a   :  { %v1030_v24 = vcombine.low %v1021_v9, %v1028_v20 }
 0x21c   :  { %v1044_v11 = vrot.slane %v1030_v24, %v1006_v51 }
 0x21e   :  { %v1045_v15 = vcombine.low %v1037_v10, %v1044_v11 }
 0x220   :  { %1047 = vst [vmem:[#allocation7] sm:$0xff] %v1045_v15 }
 0x221   :  { %1221 = shalt.err (!%p1218_p6)
}
 0x222   :  { %s1222_s13 = scalar_lea.hbm %s1495_s2, 128 }
 0x223   :  { %p1223_p7 = scmp.ne.s32.totalorder %s1495_s2, %s1222_s13  ;;  %p1226_p8 = scmp.lt.u32.totalorder %s1222_s13, %s1495_s2 }
 0x225   :  { %p1228_p9 = pnand %p1226_p8, %p1223_p7 }
 0x227   :  { %1231 = shalt.err (!%p1228_p9)
}
 0x228   :  { %1057 = dma.vmem_to_hbm [thread:$0]  %s1055_s9, 128, %s1495_s2, [#allocation4]  }
 0x229   :  { %1236 = dma.done.wait [#allocation4], 128  }
 0x22a   :  { %1237 = vsyncadd [#allocation4], 4294967168 }
 0x22b   :  { %1061 = vsyncpa [#allocation3], 1 }
 0x22c   :  { %1062 = vsyncpa [#allocation6], 1 }
 0x22d   :  { %1063 = vsyncpa [#allocation4], 1 }

</bundles_post_ra>
